<compile_context>
chip_gen: v5e
topology: v5e:2x2
jax: 0.10.0
libtpu: 0.0.40
codegen_flags: <defaults>
</compile_context>

<pallas_src>
import functools

import jax
import jax.numpy as jnp
from jax.experimental import pallas as pl
from jax.experimental.pallas import tpu as pltpu


def _round_up(x, m):
    return (x + m - 1) // m * m


def _elu(v):
    # ELU with alpha = 1.0 (f32).
    # TODO(synk): jnp.expm1 would be marginally more accurate near 0; exp-1 kept for guaranteed lowering.
    return jnp.where(v > 0, v, jnp.exp(v) - 1.0)


def _resblock_kernel(x_ref, halo_ref, w1_ref, b1_ref, w2_ref, b2_ref, o_ref, *, hidden_p):
    """One (batch, time-tile) block.

    x_ref   : (1, Tt, Dp)      input tile, channels-last, channel-padded
    halo_ref: (1, 1, 2, Dp)    row 0 = left neighbor row of this tile, row 1 = right neighbor
                               (already reflected at the global time edges)
    w1_ref  : (Dp, 3*Hp)       conv1 weights, the 3 taps stacked along the output dim
    b1_ref  : (1, Hp)          conv1 bias (f32)
    w2_ref  : (Hp, Dp)         conv2 (1x1) weights
    b2_ref  : (1, Dp)          conv2 bias (f32)
    o_ref   : (1, Tt, Dp)      output tile
    """
    Hp = hidden_p

    x = x_ref[0].astype(jnp.float32)                       # (Tt, Dp)
    h = _elu(x)
    hh = _elu(halo_ref[0, 0].astype(jnp.float32))          # (2, Dp): [left, right]

    mdt = w1_ref.dtype                                     # matmul operand dtype (bf16 or f32)

    # Fused 3-tap conv1: one long-N MXU matmul; per-tap results are lane-aligned slices.
    p = jnp.dot(h.astype(mdt), w1_ref[...], preferred_element_type=jnp.float32)    # (Tt, 3Hp)
    ph = jnp.dot(hh.astype(mdt), w1_ref[...], preferred_element_type=jnp.float32)  # (2, 3Hp)

    p0 = p[:, 0:Hp]              # W0 . h[t]
    p1 = p[:, Hp:2 * Hp]         # W1 . h[t]
    p2 = p[:, 2 * Hp:3 * Hp]     # W2 . h[t]
    left0 = ph[0:1, 0:Hp]                 # W0 . h[left neighbor]  -> feeds output row 0
    right2 = ph[1:2, 2 * Hp:3 * Hp]       # W2 . h[right neighbor] -> feeds output row Tt-1

    # y[t] = W0.h[t-1] + W1.h[t] + W2.h[t+1] + b1   (row shifts in Hp-space, not Dp-space)
    tap0 = jnp.concatenate([left0, p0[:-1, :]], axis=0)    # row t <- p0[t-1]
    tap2 = jnp.concatenate([p2[1:, :], right2], axis=0)    # row t <- p2[t+1]
    acc = p1 + tap0 + tap2 + b1_ref[...]                   # (Tt, Hp) f32

    h2 = _elu(acc)

    # 1x1 conv (hidden -> dim) as a single matmul.
    out = jnp.dot(h2.astype(mdt), w2_ref[...], preferred_element_type=jnp.float32)
    out = out + b2_ref[...]                                # (Tt, Dp) f32

    # true_skip => identity shortcut.
    o_ref[0] = (x + out).astype(o_ref.dtype)


def seanet_resnet_block_btc(x_btc, w1, b1, w2, b2, *, t_tile=1024,
                            matmul_dtype=jnp.bfloat16):
    """Channels-last entry point.  x_btc: (B, T, C).  Returns (B, T, C)."""
    B, T, C = x_btc.shape
    H = w1.shape[0]                      # hidden = dim // compress
    assert T >= 2, "reflect padding needs T >= 2"

    Dp = _round_up(C, 128)               # lane-pad channels (no-op for real SEANet dims)
    Hp = _round_up(H, 128)

    # --- weights: stack the 3 taps along the output dim -> one fused matmul per tile.
    w_all = jnp.zeros((Dp, 3 * Hp), jnp.float32)
    for k in range(3):
        w_all = w_all.at[:C, k * Hp:k * Hp + H].set(jnp.transpose(w1[:, :, k]))  # (in, out)
    w_all = w_all.astype(matmul_dtype)
    b1_k = jnp.zeros((1, Hp), jnp.float32).at[0, :H].set(b1)
    w2_k = (jnp.zeros((Hp, Dp), jnp.float32)
            .at[:H, :C].set(jnp.transpose(w2[:, :, 0]))
            .astype(matmul_dtype))
    b2_k = jnp.zeros((1, Dp), jnp.float32).at[0, :C].set(b2)

    # --- input: zero-pad channels (zeros propagate to zeros through the whole block).
    xp = x_btc
    if Dp != C:
        xp = jnp.pad(xp, ((0, 0), (0, 0), (0, Dp - C)))

    # --- time tiling.  Pad T to a tile multiple; the FIRST padded row is the reflected
    # continuation x[T-2] so the valid row T-1 still sees the correct right neighbor.
    Tt = min(_round_up(t_tile, 8), _round_up(T, 8))
    T_pad = _round_up(T, Tt)
    if T_pad != T:
        cont = xp[:, T - 2:T - 1, :]
        fill = jnp.zeros((B, T_pad - T - 1, Dp), xp.dtype)
        xp = jnp.concatenate([xp, cont, fill], axis=1)
    n_t = T_pad // Tt

    # --- per-tile halo rows (left/right neighbor, reflected at global edges), precomputed as a
    # tiny side input so every tile is an independent, fully auto-pipelined block (no overlap DMA).
    starts = jnp.arange(n_t) * Tt
    ends = starts + Tt
    left_idx = jnp.where(starts > 0, starts - 1, 1)           # reflect at t = 0
    right_idx = jnp.where(ends < T_pad, ends, T_pad - 2)      # reflect at t = T_pad-1
    halos = jnp.stack(
        [jnp.take(xp, left_idx, axis=1), jnp.take(xp, right_idx, axis=1)],
        axis=2)                                               # (B, n_t, 2, Dp)

    kernel = functools.partial(_resblock_kernel, hidden_p=Hp)

    itemsize = xp.dtype.itemsize
    flops = 2 * B * T_pad * Dp * 3 * Hp + 2 * B * T_pad * Hp * Dp
    bytes_accessed = (2 * B * T_pad * Dp * itemsize            # x in + out
                      + B * n_t * 2 * Dp * itemsize            # halos
                      + (Dp * 3 * Hp + Hp * Dp) * jnp.dtype(matmul_dtype).itemsize
                      + (Hp + Dp) * 4)

    out = pl.pallas_call(
        kernel,
        out_shape=jax.ShapeDtypeStruct((B, T_pad, Dp), x_btc.dtype),
        grid=(B, n_t),
        in_specs=[
            pl.BlockSpec((1, Tt, Dp), lambda b, t: (b, t, 0)),       # x tile
            pl.BlockSpec((1, 1, 2, Dp), lambda b, t: (b, t, 0, 0)),  # halo rows
            pl.BlockSpec((Dp, 3 * Hp), lambda b, t: (0, 0)),         # conv1 weights (resident)
            pl.BlockSpec((1, Hp), lambda b, t: (0, 0)),              # conv1 bias
            pl.BlockSpec((Hp, Dp), lambda b, t: (0, 0)),             # conv2 weights
            pl.BlockSpec((1, Dp), lambda b, t: (0, 0)),              # conv2 bias
        ],
        out_specs=pl.BlockSpec((1, Tt, Dp), lambda b, t: (b, t, 0)),
        compiler_params=pltpu.CompilerParams(
            dimension_semantics=("parallel", "parallel"),
            vmem_limit_bytes=48 * 1024 * 1024),
        cost_estimate=pl.CostEstimate(
            flops=flops,
            transcendentals=B * T_pad * (Dp + Hp),
            bytes_accessed=bytes_accessed),
    )(xp, halos, w_all, b1_k, w2_k, b2_k)

    return out[:, :T, :C]


def seanet_resnet_block(x_nct, w1, b1, w2, b2, **kwargs):
    """PyTorch-layout entry point.  x_nct: (B, C, T) -> (B, C, T).

    Note: each transpose is an extra HBM pass; callers that already hold channels-last
    activations should use seanet_resnet_block_btc directly.
    """
    x_btc = jnp.transpose(x_nct, (0, 2, 1))
    out_btc = seanet_resnet_block_btc(x_btc, w1, b1, w2, b2, **kwargs)
    return jnp.transpose(out_btc, (0, 2, 1))


def _reference(x_nct, w1, b1, w2, b2):
    """Pure-JAX reference of the same forward pass (channels-first, like PyTorch)."""
    h = jnp.where(x_nct > 0, x_nct, jnp.exp(x_nct) - 1.0)
    h = jnp.pad(h, ((0, 0), (0, 0), (1, 1)), mode="reflect")
    h = jax.lax.conv_general_dilated(
        h, w1, window_strides=(1,), padding="VALID",
        dimension_numbers=("NCH", "OIH", "NCH")) + b1[None, :, None]
    h = jnp.where(h > 0, h, jnp.exp(h) - 1.0)
    h = jax.lax.conv_general_dilated(
        h, w2, window_strides=(1,), padding="VALID",
        dimension_numbers=("NCH", "OIH", "NCH")) + b2[None, :, None]
    return x_nct + h


if __name__ == "__main__":
    # Small, module-consistent shapes: dim=8, compress=2 -> hidden=4, batch=2, T=19.
    # T=19 with t_tile=8 exercises multi-tile halos, both global reflect edges and time padding.
    B, DIM, T = 2, 8, 19
    HID = DIM // 2

    key = jax.random.PRNGKey(0)
    k_x, k_w1, k_b1, k_w2, k_b2 = jax.random.split(key, 5)

    x = jax.random.normal(k_x, (B, DIM, T), dtype=jnp.float32)
    # Conv1d(dim, hidden, k=3): weight (hidden, dim, 3), bias (hidden,)
    w1 = 0.2 * jax.random.normal(k_w1, (HID, DIM, 3), dtype=jnp.float32)
    b1 = 0.1 * jax.random.normal(k_b1, (HID,), dtype=jnp.float32)
    # Conv1d(hidden, dim, k=1): weight (dim, hidden, 1), bias (dim,)
    w2 = 0.2 * jax.random.normal(k_w2, (DIM, HID, 1), dtype=jnp.float32)
    b2 = 0.1 * jax.random.normal(k_b2, (DIM,), dtype=jnp.float32)

    ref = _reference(x, w1, b1, w2, b2)

    # f32 MXU operands: tight check of the tiling / halo / padding logic (multi-tile path).
    out_f32 = seanet_resnet_block(x, w1, b1, w2, b2, t_tile=8, matmul_dtype=jnp.float32)
    out_f32 = jax.block_until_ready(out_f32)
    assert out_f32.shape == (B, DIM, T)
    assert jnp.allclose(out_f32, ref, atol=1e-4, rtol=1e-4), "f32 path mismatch vs JAX reference"

    # Single-tile path with the default (large) tile size, f32 operands.
    out_one = seanet_resnet_block(x, w1, b1, w2, b2, matmul_dtype=jnp.float32)
    out_one = jax.block_until_ready(out_one)
    assert jnp.allclose(out_one, ref, atol=1e-4, rtol=1e-4), "single-tile path mismatch"

    # bf16 MXU operands (fast path on v6e/v7x), f32 accumulation: looser tolerance.
    out_bf16 = seanet_resnet_block(x, w1, b1, w2, b2, t_tile=8, matmul_dtype=jnp.bfloat16)
    out_bf16 = jax.block_until_ready(out_bf16)
    assert jnp.allclose(out_bf16, ref, atol=5e-2, rtol=5e-2), "bf16 path mismatch vs JAX reference"

    print("KERNEL_OK")
</pallas_src>

<mosaic_0001>
module attributes {stable_mosaic.version = 11 : i64} {
  func.func @_resblock_kernel(%arg0: i32, %arg1: i32, %arg2: memref<1x8x128xf32, #tpu.memory_space<vmem>>, %arg3: memref<1x1x2x128xf32, #tpu.memory_space<vmem>>, %arg4: memref<128x384xf32, #tpu.memory_space<vmem>>, %arg5: memref<1x128xf32, #tpu.memory_space<vmem>>, %arg6: memref<128x128xf32, #tpu.memory_space<vmem>>, %arg7: memref<1x128xf32, #tpu.memory_space<vmem>>, %arg8: memref<1x8x128xf32, #tpu.memory_space<vmem>>) attributes {dimension_semantics = [#tpu.dimension_semantics<parallel>, #tpu.dimension_semantics<parallel>], iteration_bounds = array<i64: 2, 3>, scalar_prefetch = 0 : i64, scratch_operands = 0 : i64, tpu.core_type = #tpu.core_type<tc>, window_params = [{transform_indices = @transform_0, window_bounds = array<i64: 1, 8, 128>}, {transform_indices = @transform_1, window_bounds = array<i64: 1, 1, 2, 128>}, {pipeline_mode = #tpu.pipeline_mode<synchronous>, transform_indices = @transform_2, window_bounds = array<i64: 128, 384>}, {pipeline_mode = #tpu.pipeline_mode<synchronous>, transform_indices = @transform_3, window_bounds = array<i64: 1, 128>}, {pipeline_mode = #tpu.pipeline_mode<synchronous>, transform_indices = @transform_4, window_bounds = array<i64: 128, 128>}, {pipeline_mode = #tpu.pipeline_mode<synchronous>, transform_indices = @transform_5, window_bounds = array<i64: 1, 128>}, {transform_indices = @transform_6, window_bounds = array<i64: 1, 8, 128>}]} {
    %c0 = arith.constant 0 : index
    %c0_0 = arith.constant 0 : index
    %c0_1 = arith.constant 0 : index
    %0 = vector.load %arg2[%c0, %c0_0, %c0_1] : memref<1x8x128xf32, #tpu.memory_space<vmem>>, vector<1x8x128xf32>
    %1 = vector.shape_cast %0 : vector<1x8x128xf32> to vector<8x128xf32>
    %cst = arith.constant 0.000000e+00 : f32
    %2 = vector.broadcast %cst : f32 to vector<8x128xf32>
    %3 = arith.cmpf ogt, %1, %2 : vector<8x128xf32>
    %4 = math.exp %1 : vector<8x128xf32>
    %cst_2 = arith.constant 1.000000e+00 : f32
    %5 = vector.broadcast %cst_2 : f32 to vector<8x128xf32>
    %6 = arith.subf %4, %5 : vector<8x128xf32>
    %7 = arith.select %3, %1, %6 : vector<8x128xi1>, vector<8x128xf32>
    %c0_3 = arith.constant 0 : index
    %c0_4 = arith.constant 0 : index
    %c0_5 = arith.constant 0 : index
    %c0_6 = arith.constant 0 : index
    %8 = vector.load %arg3[%c0_3, %c0_4, %c0_5, %c0_6] : memref<1x1x2x128xf32, #tpu.memory_space<vmem>>, vector<1x1x2x128xf32>
    %9 = vector.shape_cast %8 : vector<1x1x2x128xf32> to vector<2x128xf32>
    %cst_7 = arith.constant 0.000000e+00 : f32
    %10 = vector.broadcast %cst_7 : f32 to vector<2x128xf32>
    %11 = arith.cmpf ogt, %9, %10 : vector<2x128xf32>
    %12 = math.exp %9 : vector<2x128xf32>
    %cst_8 = arith.constant 1.000000e+00 : f32
    %13 = vector.broadcast %cst_8 : f32 to vector<2x128xf32>
    %14 = arith.subf %12, %13 : vector<2x128xf32>
    %15 = arith.select %11, %9, %14 : vector<2x128xi1>, vector<2x128xf32>
    %c0_9 = arith.constant 0 : index
    %c0_10 = arith.constant 0 : index
    %16 = vector.load %arg4[%c0_9, %c0_10] : memref<128x384xf32, #tpu.memory_space<vmem>>, vector<128x384xf32>
    %cst_11 = arith.constant dense<0.000000e+00> : vector<8x384xf32>
    %17 = tpu.matmul %7, %16, %cst_11 {dimension_numbers = #tpu.dot_dimension_numbers<[1], [0], [0], [1], [0, 0, 1, 1], [], []>} : vector<8x128xf32>, vector<128x384xf32>, vector<8x384xf32> -> vector<8x384xf32>
    %c0_12 = arith.constant 0 : index
    %c0_13 = arith.constant 0 : index
    %18 = vector.load %arg4[%c0_12, %c0_13] : memref<128x384xf32, #tpu.memory_space<vmem>>, vector<128x384xf32>
    %cst_14 = arith.constant dense<0.000000e+00> : vector<2x384xf32>
    %19 = tpu.matmul %15, %18, %cst_14 {dimension_numbers = #tpu.dot_dimension_numbers<[1], [0], [0], [1], [0, 0, 1, 1], [], []>} : vector<2x128xf32>, vector<128x384xf32>, vector<2x384xf32> -> vector<2x384xf32>
    %20 = vector.extract_strided_slice %17 {offsets = [0, 0], sizes = [8, 128], strides = [1, 1]} : vector<8x384xf32> to vector<8x128xf32>
    %21 = vector.extract_strided_slice %17 {offsets = [0, 128], sizes = [8, 128], strides = [1, 1]} : vector<8x384xf32> to vector<8x128xf32>
    %22 = vector.extract_strided_slice %17 {offsets = [0, 256], sizes = [8, 128], strides = [1, 1]} : vector<8x384xf32> to vector<8x128xf32>
    %23 = vector.extract_strided_slice %19 {offsets = [0, 0], sizes = [1, 128], strides = [1, 1]} : vector<2x384xf32> to vector<1x128xf32>
    %24 = vector.extract_strided_slice %19 {offsets = [1, 256], sizes = [1, 128], strides = [1, 1]} : vector<2x384xf32> to vector<1x128xf32>
    %25 = vector.extract_strided_slice %20 {offsets = [0, 0], sizes = [7, 128], strides = [1, 1]} : vector<8x128xf32> to vector<7x128xf32>
    %26 = tpu.concatenate %23, %25 in 0 : vector<1x128xf32>, vector<7x128xf32> -> vector<8x128xf32>
    %27 = vector.extract_strided_slice %22 {offsets = [1, 0], sizes = [7, 128], strides = [1, 1]} : vector<8x128xf32> to vector<7x128xf32>
    %28 = tpu.concatenate %27, %24 in 0 : vector<7x128xf32>, vector<1x128xf32> -> vector<8x128xf32>
    %29 = arith.addf %21, %26 : vector<8x128xf32>
    %30 = arith.addf %29, %28 : vector<8x128xf32>
    %c0_15 = arith.constant 0 : index
    %c0_16 = arith.constant 0 : index
    %31 = vector.load %arg5[%c0_15, %c0_16] : memref<1x128xf32, #tpu.memory_space<vmem>>, vector<1x128xf32>
    %32 = vector.broadcast %31 : vector<1x128xf32> to vector<8x128xf32>
    %33 = arith.addf %30, %32 : vector<8x128xf32>
    %cst_17 = arith.constant 0.000000e+00 : f32
    %34 = vector.broadcast %cst_17 : f32 to vector<8x128xf32>
    %35 = arith.cmpf ogt, %33, %34 : vector<8x128xf32>
    %36 = math.exp %33 : vector<8x128xf32>
    %cst_18 = arith.constant 1.000000e+00 : f32
    %37 = vector.broadcast %cst_18 : f32 to vector<8x128xf32>
    %38 = arith.subf %36, %37 : vector<8x128xf32>
    %39 = arith.select %35, %33, %38 : vector<8x128xi1>, vector<8x128xf32>
    %c0_19 = arith.constant 0 : index
    %c0_20 = arith.constant 0 : index
    %40 = vector.load %arg6[%c0_19, %c0_20] : memref<128x128xf32, #tpu.memory_space<vmem>>, vector<128x128xf32>
    %cst_21 = arith.constant dense<0.000000e+00> : vector<8x128xf32>
    %41 = tpu.matmul %39, %40, %cst_21 {dimension_numbers = #tpu.dot_dimension_numbers<[1], [0], [0], [1], [0, 0, 1, 1], [], []>} : vector<8x128xf32>, vector<128x128xf32>, vector<8x128xf32> -> vector<8x128xf32>
    %c0_22 = arith.constant 0 : index
    %c0_23 = arith.constant 0 : index
    %42 = vector.load %arg7[%c0_22, %c0_23] : memref<1x128xf32, #tpu.memory_space<vmem>>, vector<1x128xf32>
    %43 = vector.broadcast %42 : vector<1x128xf32> to vector<8x128xf32>
    %44 = arith.addf %41, %43 : vector<8x128xf32>
    %45 = arith.addf %1, %44 : vector<8x128xf32>
    %c0_24 = arith.constant 0 : index
    %c0_25 = arith.constant 0 : index
    %c0_26 = arith.constant 0 : index
    %46 = vector.load %arg8[%c0_24, %c0_25, %c0_26] : memref<1x8x128xf32, #tpu.memory_space<vmem>>, vector<1x8x128xf32>
    %47 = vector.shape_cast %46 : vector<1x8x128xf32> to vector<8x128xf32>
    %48 = vector.shape_cast %45 : vector<8x128xf32> to vector<1x8x128xf32>
    tpu.vector_store %arg8[%c0_24, %c0_25, %c0_26], %48 {strides = array<i32>} : memref<1x8x128xf32, #tpu.memory_space<vmem>>, vector<1x8x128xf32>,
    return
  }
  func.func @transform_0(%arg0: i32, %arg1: i32) -> (i32, i32, i32) {
    %c0_i32 = arith.constant 0 : i32
    %c0_i32_0 = arith.constant 0 : i32
    return %arg0, %arg1, %c0_i32 : i32, i32, i32
  }
  func.func @transform_1(%arg0: i32, %arg1: i32) -> (i32, i32, i32, i32) {
    %c0_i32 = arith.constant 0 : i32
    %c0_i32_0 = arith.constant 0 : i32
    %c0_i32_1 = arith.constant 0 : i32
    return %arg0, %arg1, %c0_i32, %c0_i32_0 : i32, i32, i32, i32
  }
  func.func @transform_2(%arg0: i32, %arg1: i32) -> (i32, i32) {
    %c0_i32 = arith.constant 0 : i32
    %c0_i32_0 = arith.constant 0 : i32
    %c0_i32_1 = arith.constant 0 : i32
    return %c0_i32, %c0_i32_0 : i32, i32
  }
  func.func @transform_3(%arg0: i32, %arg1: i32) -> (i32, i32) {
    %c0_i32 = arith.constant 0 : i32
    %c0_i32_0 = arith.constant 0 : i32
    %c0_i32_1 = arith.constant 0 : i32
    return %c0_i32, %c0_i32_0 : i32, i32
  }
  func.func @transform_4(%arg0: i32, %arg1: i32) -> (i32, i32) {
    %c0_i32 = arith.constant 0 : i32
    %c0_i32_0 = arith.constant 0 : i32
    %c0_i32_1 = arith.constant 0 : i32
    return %c0_i32, %c0_i32_0 : i32, i32
  }
  func.func @transform_5(%arg0: i32, %arg1: i32) -> (i32, i32) {
    %c0_i32 = arith.constant 0 : i32
    %c0_i32_0 = arith.constant 0 : i32
    %c0_i32_1 = arith.constant 0 : i32
    return %c0_i32, %c0_i32_0 : i32, i32
  }
  func.func @transform_6(%arg0: i32, %arg1: i32) -> (i32, i32, i32) {
    %c0_i32 = arith.constant 0 : i32
    %c0_i32_0 = arith.constant 0 : i32
    return %arg0, %arg1, %c0_i32 : i32, i32, i32
  }
}

</mosaic_0001>

<bundles_post_ra>
// kernel: tpu_custom_call.1
= control target key start
LH: loop header
LB: loop body
LE: loop exit
PB: predicated region body
PF: predicated region fallthrough
CT: control target
= control target key end

     0   :  { %s1411_s0 = inlined_call_operand.hbm [shape: f32[2,24,128], index: 0, kind: input, shape index: {}]   ;;  %s1412_s1 = inlined_call_operand.hbm [shape: f32[2,3,2,128], index: 1, kind: input, shape index: {}]   ;;  %s1413_s2 = inlined_call_operand.hbm [shape: f32[128,384], index: 2, kind: input, shape index: {}]   ;;  %s1414_s3 = inlined_call_operand.vmem [shape: f32[1,128], index: 3, kind: input, shape index: {}]   ;;  %s1415_s4 = inlined_call_operand.hbm [shape: f32[128,128], index: 4, kind: input, shape index: {}]   ;;  %s1416_s5 = inlined_call_operand.vmem [shape: f32[1,128], index: 5, kind: input, shape index: {}]   ;;  %s1417_s6 = inlined_call_operand.hbm [shape: f32[2,24,128], index: 6, kind: output, shape index: {}]  }
   0x1   :  { %1424 = sst [smem:[#allocation21_spill]] %s1411_s0 }
   0x2   :  { %1425 = sst [smem:[#allocation22_spill]] %s1413_s2 }
   0x3   :  { %1426 = sst [smem:[#allocation23_spill]] %s1415_s4 }
   0x4   :  { %11 = vsyncpa [#allocation3], 0 }
   0x5   :  { %13 = vsyncpa [#allocation3 + $0x1], 0 }
   0x6   :  { %14 = vsyncpa [#allocation6], 0 }
   0x7   :  { %16 = vsyncpa [#allocation6 + $0x1], 0 }
   0x8   :  { %17 = vsyncpa [#allocation9], 0 }
   0x9   :  { %18 = vsyncpa [#allocation4], 0 }
   0xa   :  { %20 = vsyncpa [#allocation4 + $0x1], 0  ;;  %s1152_s21 = smov 0   ;;  %s1154_s22 = smov 0  }
   0xb   :  { %s1156_s23 = smov 0   ;;  %s1158_s24 = smov 0  }
   0xc   :  { %s1160_s25 = smov 0   ;;  %s1162_s26 = smov 0  }
   0xd   :  { %s1164_s27 = smov 0   ;;  %s1166_s28 = smov 0  }
   0xe LB: > { %1427 = sst [smem:[#allocation16_spill]] %s1081_s21  ;;  %s1193_s29 = sadd.s32 4294967295, %s1109_s28   ;;  %s1109_s28 = sphi %s1166_s28, %s26_s28   ;;  %s1105_s27 = sphi %s1164_s27, %s1445_s27   ;;  %s1101_s26 = sphi %s1162_s26, %s1450_s26   ;;  %s1097_s25 = sphi %s1160_s25, %s1443_s25   ;;  %s1093_s24 = sphi %s1158_s24, %s1449_s24   ;;  %s1089_s23 = sphi %s1156_s23, %s1448_s23   ;;  %s1085_s22 = sphi %s1154_s22, %s1447_s22   ;;  %s1081_s21 = sphi %s1152_s21, %s1446_s21  }
   0xf   : > { %1428 = sst [smem:[#allocation17_spill]] %s1105_s27  ;;  %p739_p0 = scmp.ge.s32.totalorder %s1109_s28, 1 }
  0x10   : > { %p61_p1 = scmp.eq.s32.totalorder %s1193_s29, 0  ;;  %p211_p2 = scmp.lt.s32.totalorder %s1109_s28, 7 }
  0x11   : > { %s1429_s2 = sld [smem:[#allocation22_spill]]  ;;  %s1111_s10 = smov [#allocation7]  }
  0x12   : > { %p1201_p3 = pnand %p739_p0, %p211_p2  ;;  %s224_s11 = sshll.u32 %s1111_s10, 4  ;;  %s225_s11 = int_to_ptr.vmem [resolvable:$true] %s224_s11 }
  0x13   : > { %s1431_s4 = sld [smem:[#allocation23_spill]]  ;;  %s1112_s15 = smov 384  }
  0x14   : > { %p777_p4 = pneg %p1201_p3  ;;  %s1113_s16 = smov 24  }
  0x15   : > { %s1114_s17 = smov [#allocation8]   ;;  %s1115_s19 = smov 128  }
  0x16   : > { %p778_p5 = pnand %p777_p4, %p61_p1  ;;  %s241_s18 = sshll.u32 %s1114_s17, 4  ;;  %s242_s18 = int_to_ptr.vmem [resolvable:$true] %s241_s18 }
  0x17   : > { %s222_s8 = sshll.u32 %s1429_s2, 4  ;;  %s1116_s20 = smov 8   ;;  %s223_s8 = int_to_ptr.hbm [resolvable:$true] %s222_s8 }
  0x18   : > { %780 = dma.hbm_to_vmem [thread:$0]  (!%p778_p5), %s223_s8, 6144, %s225_s11, [#allocation6], %s1112_s15, %s1112_s15, %s1113_s16  }
  0x19   : > { %s239_s14 = sshll.u32 %s1431_s4, 4  ;;  %s738_s30 = sadd.s32 4294967294, %s1109_s28   ;;  %s240_s14 = int_to_ptr.hbm [resolvable:$true] %s239_s14 }
  0x1a   : > { %783 = dma.hbm_to_vmem [thread:$0]  (!%p778_p5), %s240_s14, 2048, %s242_s18, [#allocation9], %s1115_s19, %s1115_s19, %s1116_s20  }
  0x1b   : > { %s35_s7 = sadd.s32 1, %s1101_s26  ;;  %s38_s10 = sadd.s32 1, %s1105_s27 }
  0x1c   : > { %p36_p6 = scmp.ge.s32.totalorder %s35_s7, 3  ;;  %s47_s12 = sadd.s32 1, %s1089_s23 }
  0x1d   : > { %p54_p7 = scmp.ne.s32.totalorder %s1089_s23, %s1085_s22  ;;  %p55_p8 = scmp.eq.s32.totalorder %s1109_s28, 0 }
  0x1e   : > { %s1452_s7 = smov (%p36_p6, %s35_s7), 0  ;;  %s1454_s10 = smov (!%p36_p6, %s38_s10), %s1105_s27 }
  0x1f   : > { %1432 = sst [smem:[#allocation18_spill]] %s1452_s7  ;;  %s43_s8 = ssub.s32 %s1101_s26, %s1452_s7 }
  0x20   : > { %p40_p9 = scmp.ge.s32.totalorder %s1454_s10, 2  ;;  %p60_p10 = scmp.ne.s32.totalorder %s1085_s22, %s1081_s21 }
  0x21   : > { %p1226_p11 = por %p55_p8, %p54_p7  ;;  %p198_p12 = scmp.eq.s32.totalorder %s1193_s29, 5 }
  0x22   : > { %s1456_s10 = smov (%p40_p9, %s1454_s10), 0  ;;  %p1235_p13 = por %p61_p1, %p60_p10 }
  0x23   : > { %1434 = sst [smem:[#allocation19_spill]] %s1456_s10  ;;  %p1239_p0 = por %p198_p12, %p54_p7 }
  0x24   : > { %s42_s15 = ssub.s32 %s1105_s27, %s1456_s10  ;;  %p204_p2 = scmp.eq.s32.totalorder %s738_s30, 5 }
  0x25   : > { %s1436_s14 = scalar_select %p1239_p0, 1, 0 }
  0x26   : > { %s44_s16 = sor.u32 %s43_s8, %s42_s15  ;;  %p797_p4 = scmp.lt.s32.totalorder %s1109_s28, 6 }
  0x27   : > { %1437 = sst [smem:[#allocation20_spill]] %s1436_s14  ;;  %p45_p5 = scmp.eq.s32.totalorder %s44_s16, 0 }
  0x28   : > { %p1246_p6 = por %p204_p2, %p60_p10  ;;  %s258_s18 = sand.u32 1, %s1089_s23  }
  0x29   : > { %s760_s19 = smul.u32 3, %s1105_s27  ;;  %s743_s2 = sshll.u32 %s258_s18, 3 }
  0x2a   : > { %s1253_s20 = scalar_select %p45_p5, %s1089_s23, %s47_s12  }
  0x2b   : > { %s266_s4 = sadd.s32 %s1101_s26, %s760_s19  ;;  %s262_s21 = scalar_lea.vmem [#allocation2], %s743_s2 }
  0x2c   : > { %s744_s7 = sshll.u32 %s266_s4, 3  ;;  %s272_s10 = sshll.u32 %s262_s21, 4  ;;  %s273_s10 = int_to_ptr.vmem [resolvable:$true] %s272_s10 }
  0x2d   : > { %s1439_s0 = sld [smem:[#allocation21_spill]]  ;;  %p1263_p7 = pnand %p797_p4, %p1226_p11 }
  0x2e   : > { %s746_s12 = sshll.u32 %s266_s4, 1  ;;  %s279_s19 = sand.u32 1, %s1109_s28  }
  0x2f   : > { %s259_s27 = scalar_lea.sflag [#allocation3], %s258_s18  ;;  %s745_s2 = sshll.u32 %s258_s18, 1 }
  0x30   : > { %s283_s11 = scalar_lea.vmem [#allocation5], %s745_s2  ;;  %s1278_s4 = sand.u32 (!%p1201_p3), 1, %s1085_s22  }
  0x33   : > { %s268_s8 = scalar_lea.hbm %s1439_s0, %s744_s7  ;;  %s289_s7 = scalar_lea.hbm %s1412_s1, %s746_s12 }
  0x34   : > { %s270_s15 = sshll.u32 %s268_s8, 4  ;;  %s291_s30 = sshll.u32 %s289_s7, 4  ;;  %s271_s15 = int_to_ptr.hbm [resolvable:$true] %s270_s15  ;;  %s292_s30 = int_to_ptr.hbm [resolvable:$true] %s291_s30 }
  0x35   : > { %787 = dma.hbm_to_vmem [thread:$0]  (!%p1263_p7), %s271_s15, 128, %s273_s10, %s259_s27  }
  0x36   : > { %s293_s8 = sshll.u32 %s283_s11, 4  ;;  %s280_s0 = scalar_lea.sflag [#allocation6], %s279_s19  ;;  %s294_s8 = int_to_ptr.vmem [resolvable:$true] %s293_s8 }
  0x37   : > { %790 = dma.hbm_to_vmem [thread:$0]  (!%p1263_p7), %s292_s30, 32, %s294_s8, %s280_s0  }
  0x38   : > { %302 = sbr.rel (%p1201_p3) target bundleno = 411 (0x19b), region = 44  ;;  %s748_s27 = sshll.u32 (!%p1201_p3), %s1278_s4, 3 }
  0x39   : > { %s305_s10 = scalar_lea.sflag (!%p1201_p3), [#allocation3], %s1278_s4  ;;  %s1284_s18 = scalar_lea.vmem (!%p1201_p3), [#allocation2], %s748_s27 }
  0x3d   : > { %1060 = dma.done.wait (%p1235_p13), %s305_s10, 128  }
  0x3e   : > { %1062 = vsyncadd (%p1235_p13), %s305_s10, 4294967168  ;;  %s314_s0 = sand.u32 1, %s1193_s29   ;;  %s749_s9 = sshll.u32 %s1278_s4, 1 }
  0x3f   : > { %s315_s15 = scalar_lea.sflag [#allocation6], %s314_s0  ;;  %s1292_s16 = scalar_lea.vmem [#allocation5], %s749_s9 }
  0x40   : > { %1064 = dma.done.wait (%p1235_p13), %s315_s15, 32  }
  0x41   : > { %1066 = vsyncadd (%p1235_p13), %s315_s15, 4294967264 }
  0x42   : > { %1068 = dma.done.wait (%p61_p1), [#allocation6], 6144  }
  0x43   : > { %1070 = vsyncadd (%p61_p1), [#allocation6], 4294961152 }
  0x44   : > { %1072 = dma.done.wait (%p61_p1), [#allocation9], 2048  }
  0x45   : > { %1074 = vsyncadd (%p61_p1), [#allocation9], 4294965248  ;;  %v420_v0 = vld [vmem:[#allocation7 + $0x168] sm:$0xff]  ;;  %v417_v1 = vld [vmem:[#allocation7 + $0x150] sm:$0xff]  ;;  %vm526_vm2 = vcmask 1040384   ;;  %vm534_vm3 = vcmask 1046528  }
  0x46   : > { %423 = vmatpush.msra.mxu0 %v420_v0  ;;  %483 = vmatpush.msra.mxu3 %v420_v0  ;;  %v414_v2 = vld [vmem:[#allocation7 + $0x138] sm:$0xff]  ;;  %v411_v3 = vld [vmem:[#allocation7 + $0x120] sm:$0xff]  ;;  %v421_v5 = vld [vmem:[#allocation7 + $0x170] sm:$0xff]  ;;  %s762_s12 = smul.u32 3, %s1097_s25  ;;  %s362_s10 = scalar_lea.vmem [#allocation10], %s748_s27 }
  0x47   : > { %v1306_v4 = vld [vmem:[#allocation7 + $0x178] sm:$0xff]  ;;  %v1308_v6 = vld [vmem:[#allocation7 + $0x160] sm:$0xff]  ;;  %v408_v7 = vld [vmem:[#allocation7 + $0x108] sm:$0xff]  ;;  %443 = vmatpush.msra.mxu1 %v421_v5  ;;  %s1019_s27 = scalar_lea.hbm %s1417_s6, 48 }
  0x48   : > { %424 = vmatpush.msra.mxu0 %v417_v1  ;;  %484 = vmatpush.msra.mxu3 %v417_v1  ;;  %v418_v8 = vld [vmem:[#allocation7 + $0x158] sm:$0xff]  ;;  %v1311_v9 = vld [vmem:[#allocation7 + $0x148] sm:$0xff]  ;;  %v415_v10 = vld [vmem:[#allocation7 + $0x140] sm:$0xff]  ;;  %s601_s19 = sadd.s32 %s1093_s24, %s762_s12  ;;  %s591_s24 = scalar_lea.sflag [#allocation4], %s1278_s4 }
  0x49   : > { %463 = vmatpush.msra.mxu2 %v1306_v4  ;;  %v405_v11 = vld [vmem:[#allocation7 + $0xf0] sm:$0xff]  ;;  %444 = vmatpush.msra.mxu1 %v418_v8  ;;  %v412_v13 = vld [vmem:[#allocation7 + $0x128] sm:$0xff]  ;;  %v402_v14 = vld [vmem:[#allocation7 + $0xd8] sm:$0xff]  ;;  %s757_s2 = sshll.u32 %s601_s19, 3 }
  0x4a   : > { %425 = vmatpush.msra.mxu0 %v414_v2  ;;  %485 = vmatpush.msra.mxu3 %v414_v2  ;;  %v1314_v12 = vld [vmem:[#allocation7 + $0x130] sm:$0xff]  ;;  %v1317_v15 = vld [vmem:[#allocation7 + $0x118] sm:$0xff]  ;;  %v399_v18 = vld [vmem:[#allocation7 + $0xc0] sm:$0xff]  ;;  %s603_s8 = scalar_lea.hbm %s1417_s6, %s757_s2 }
  0x4b   : > { %464 = vmatpush.msra.mxu2 %v1308_v6  ;;  %445 = vmatpush.msra.mxu1 %v415_v10  ;;  %v409_v16 = vld [vmem:[#allocation7 + $0x110] sm:$0xff]  ;;  %v1320_v17 = vld [vmem:[%s1292_s16] sm:$0x3]  ;;  %v1323_v19 = vld [vmem:[#allocation7 + $0x100] sm:$0xff]  ;;  %s607_s0 = sshll.u32 %s603_s8, 4  ;;  %s608_s0 = int_to_ptr.hbm [resolvable:$true] %s607_s0 }
  0x4c   : > { %426 = vmatpush.msra.mxu0 %v411_v3  ;;  %486 = vmatpush.msra.mxu3 %v411_v3  ;;  %v371_v20 = vmul.f32 1.442695, %v1320_v17  ;;  %v1327_v21 = vld [vmem:[%s1284_s18] sm:$0xff]  ;;  %v403_v25 = vld [vmem:[#allocation7 + $0xe0] sm:$0xff]  ;;  %vm370_vm0 = vcmp.gt.f32.partialorder %v1320_v17, 0.0  ;;  %s605_s18 = sshll.u32 %s362_s10, 4  ;;  %s606_s18 = int_to_ptr.vmem [resolvable:$true] %s605_s18 }
  0x4d   : > { %465 = vmatpush.msra.mxu2 %v1311_v9  ;;  %446 = vmatpush.msra.mxu1 %v412_v13  ;;  %v406_v22 = vld [vmem:[#allocation7 + $0xf8] sm:$0xff]  ;;  %v396_v23 = vld [vmem:[#allocation7 + $0xa8] sm:$0xff]  ;;  %v365_v26 = vmul.f32 1.442695, %v1327_v21  ;;  %v393_v27 = vld [vmem:[#allocation7 + $0x90] sm:$0xff]  ;;  %vm364_vm1 = vcmp.gt.f32.partialorder %v1327_v21, 0.0 }
  0x4e   : > { %427 = vmatpush.msra.mxu0 %v408_v7  ;;  %487 = vmatpush.msra.mxu3 %v408_v7  ;;  %v1330_v24 = vld [vmem:[#allocation7 + $0xe8] sm:$0xff]  ;;  %873 = vpow2.f32 %v371_v20  ;;  %v1334_v28 = vld [vmem:[#allocation7 + $0xd0] sm:$0xff]  ;;  %v390_v30 = vld [vmem:[#allocation7 + $0x78] sm:$0xff]  ;;  %s1013_s25 = sshra.s32 %s608_s0, 4  ;;  %s1014_s25 = int_to_ptr.hbm [resolvable:$true] %s1013_s25 }
  0x4f   : > { %466 = vmatpush.msra.mxu2 %v1314_v12  ;;  %447 = vmatpush.msra.mxu1 %v409_v16  ;;  %v400_v29 = vld [vmem:[#allocation7 + $0xc8] sm:$0xff]  ;;  %v1337_v31 = vld [vmem:[#allocation7 + $0xb8] sm:$0xff]  ;;  %v397_v32 = vld [vmem:[#allocation7 + $0xb0] sm:$0xff]  ;;  %875 = vpow2.f32 %v365_v26  ;;  %s1015_s9 = scalar_lea.hbm %s1014_s25, 8  ;;  %p1020_p9 = scmp.lt.s32.totalorder %s1014_s25, %s1417_s6 }
  0x50   : > { %428 = vmatpush.msra.mxu0 %v405_v11  ;;  %488 = vmatpush.msra.mxu3 %v405_v11  ;;  %v387_v33 = vld [vmem:[#allocation7 + $0x60] sm:$0xff]  ;;  %v394_v35 = vld [vmem:[#allocation7 + $0x98] sm:$0xff]  ;;  %v384_v37 = vld [vmem:[#allocation7 + $0x48] sm:$0xff]  ;;  %p1016_p1 = scmp.ne.s32.totalorder %s1014_s25, %s1015_s9  ;;  %p1021_p10 = scmp.lt.s32.totalorder %s1019_s27, %s1015_s9 }
  0x51   : > { %467 = vmatpush.msra.mxu2 %v1317_v15  ;;  %448 = vmatpush.msra.mxu1 %v406_v22  ;;  %v1340_v34 = vld [vmem:[#allocation7 + $0xa0] sm:$0xff]  ;;  %v392_v38 = vld [vmem:[#allocation7 + $0x88] sm:$0xff]  ;;  %v381_v40 = vld [vmem:[#allocation7 + $0x30] sm:$0xff] }
  0x52   : > { %429 = vmatpush.msra.mxu0 %v402_v14  ;;  %489 = vmatpush.msra.mxu3 %v402_v14  ;;  %v391_v39 = vld [vmem:[#allocation7 + $0x80] sm:$0xff]  ;;  %v389_v42 = vld [vmem:[#allocation7 + $0x70] sm:$0xff]  ;;  %v388_v43 = vld [vmem:[#allocation7 + $0x68] sm:$0xff]  ;;  %p1017_p3 = pnand %p1016_p1, %p1239_p0  ;;  %p1022_p11 = por %p1021_p10, %p1020_p9 }
  0x53   : > { %468 = vmatpush.msra.mxu2 %v1323_v19  ;;  %449 = vmatpush.msra.mxu1 %v403_v25  ;;  %v378_v45 = vld [vmem:[#allocation7 + $0x18] sm:$0xff]  ;;  %v385_v47 = vld [vmem:[#allocation7 + $0x50] sm:$0xff]  ;;  %v375_v48 = vld [vmem:[#allocation7] sm:$0xff] }
  0x54   : > { %430 = vmatpush.msra.mxu0 %v399_v18  ;;  %490 = vmatpush.msra.mxu3 %v399_v18  ;;  %v874_v36 = vpop.eup %873  ;;  %v386_v46 = vld [vmem:[#allocation7 + $0x58] sm:$0xff]  ;;  %v383_v51 = vld [vmem:[#allocation7 + $0x40] sm:$0xff]  ;;  %v380_v53 = vld [vmem:[#allocation7 + $0x28] sm:$0xff]  ;;  %p1018_p8 = pneg %p1017_p3 }
  0x55   : > { %469 = vmatpush.msra.mxu2 %v1330_v24  ;;  %450 = vmatpush.msra.mxu1 %v400_v29  ;;  %v876_v41 = vpop.eup %875  ;;  %v754_v44 = vadd.f32 -1.0, %v874_v36  ;;  %v382_v52 = vld [vmem:[#allocation7 + $0x38] sm:$0xff]  ;;  %v379_v55 = vld [vmem:[#allocation7 + $0x20] sm:$0xff]  ;;  %v377_v56 = vld [vmem:[#allocation7 + $0x10] sm:$0xff] }
  0x56   : > { %431 = vmatpush.msra.mxu0 %v396_v23  ;;  %491 = vmatpush.msra.mxu3 %v396_v23  ;;  %v753_v49 = vadd.f32 -1.0, %v876_v41  ;;  %v376_v57 = vld [vmem:[#allocation7 + $0x8] sm:$0xff]  ;;  %v563_v58 = vld [vmem:[#allocation8 + $0x78] sm:$0xff]  ;;  %v562_v59 = vld [vmem:[#allocation8 + $0x70] sm:$0xff]  ;;  %p1023_p12 = pnand %p1022_p11, %p1018_p8 }
  0x57   : > { %470 = vmatpush.msra.mxu2 %v1334_v28  ;;  %451 = vmatpush.msra.mxu1 %v397_v32  ;;  %v374_v50 = vsel %vm370_vm0, %v1320_v17, %v754_v44  ;;  %v561_v60 = vld [vmem:[#allocation8 + $0x68] sm:$0xff]  ;;  %v560_v61 = vld [vmem:[#allocation8 + $0x60] sm:$0xff]  ;;  %v559_v62 = vld [vmem:[#allocation8 + $0x58] sm:$0xff] }
  0x58   : > { %432 = vmatpush.msra.mxu0 %v393_v27  ;;  %492 = vmatpush.msra.mxu3 %v393_v27  ;;  %v368_v54 = vsel %vm364_vm1, %v1327_v21, %v753_v49  ;;  %v558_v63 = vld [vmem:[#allocation8 + $0x50] sm:$0xff]  ;;  %v557_v0 = vld [vmem:[#allocation8 + $0x48] sm:$0xff]  ;;  %v556_v1 = vld [vmem:[#allocation8 + $0x40] sm:$0xff] }
  0x59   : > { %471 = vmatpush.msra.mxu2 %v1337_v31  ;;  %452 = vmatpush.msra.mxu1 %v394_v35  ;;  %v555_v2 = vld [vmem:[#allocation8 + $0x38] sm:$0xff]  ;;  %v554_v3 = vld [vmem:[#allocation8 + $0x30] sm:$0xff]  ;;  %v552_v5 = vld [vmem:[#allocation8 + $0x20] sm:$0xff] }
  0x5a   : > { %433 = vmatpush.msra.mxu0 %v390_v30  ;;  %493 = vmatpush.msra.mxu3 %v390_v30  ;;  %v550_v7 = vld [vmem:[#allocation8 + $0x10] sm:$0xff]  ;;  %v549_v8 = vld [vmem:[#allocation8 + $0x8] sm:$0xff] }
  0x5b   : > { %472 = vmatpush.msra.mxu2 %v1340_v34  ;;  %453 = vmatpush.msra.mxu1 %v391_v39  ;;  %v871_v20 = vld [vmem:[%s1414_s3] ss:$0 sm:$0xff] }
  0x5c   : > { %434 = vmatpush.msra.mxu0 %v387_v33  ;;  %494 = vmatpush.msra.mxu3 %v387_v33  ;;  %v872_v29 = vld [vmem:[%s1416_s5] ss:$0 sm:$0xff] }
  0x5d   : > { %473 = vmatpush.msra.mxu2 %v392_v38  ;;  %454 = vmatpush.msra.mxu1 %v388_v43 }
  0x5e   : > { %435 = vmatpush.msra.mxu0 %v384_v37  ;;  %495 = vmatpush.msra.mxu3 %v384_v37 }
  0x5f   : > { %474 = vmatpush.msra.mxu2 %v389_v42  ;;  %455 = vmatpush.msra.mxu1 %v385_v47 }
  0x60   : > { %436 = vmatpush.msra.mxu0 %v381_v40  ;;  %496 = vmatpush.msra.mxu3 %v381_v40 }
  0x61   : > { %475 = vmatpush.msra.mxu2 %v386_v46  ;;  %456 = vmatpush.msra.mxu1 %v382_v52 }
  0x62   : > { %437 = vmatpush.msra.mxu0 %v378_v45  ;;  %497 = vmatpush.msra.mxu3 %v378_v45 }
  0x63   : > { %476 = vmatpush.msra.mxu2 %v383_v51  ;;  %457 = vmatpush.msra.mxu1 %v379_v55 }
  0x64   : > { %438 = vmatpush.msra.mxu0 %v375_v48  ;;  %498 = vmatpush.msra.mxu3 %v375_v48 }
  0x65   : > { %499 = vmatmul.f32.vlgmr.msra.gmra.mxu3 %v374_v50  ;;  %477 = vmatpush.msra.mxu2 %v380_v53 }
  0x66   : > { %503 = vmatpush.msrb.mxu0 %v1306_v4  ;;  %458 = vmatpush.msra.mxu1 %v376_v57  ;;  %v553_v4 = vld [vmem:[#allocation8 + $0x28] sm:$0xff] }
  0x67   : > { %439 = vmatmul.f32.vlgmr.msra.gmra.mxu0 %v368_v54  ;;  %478 = vmatpush.msra.mxu2 %v377_v56 }
  0x68   : > { %504 = vmatpush.msrb.mxu0 %v1308_v6  ;;  %479 = vmatmul.f32.vlgmr.msra.gmra.mxu2 %v368_v54  ;;  %v551_v6 = vld [vmem:[#allocation8 + $0x18] sm:$0xff] }
  0x69   : > { %459 = vmatmul.f32.vlgmr.msra.gmra.mxu1 %v368_v54 }
  0x6a   : > { %505 = vmatpush.msrb.mxu0 %v1311_v9  ;;  %568 = vmatpush.msrb.mxu1 %v563_v58  ;;  %v548_v9 = vld [vmem:[#allocation8] sm:$0xff] }
  0x6c   : > { %506 = vmatpush.msrb.mxu0 %v1314_v12  ;;  %569 = vmatpush.msrb.mxu1 %v562_v59 }
  0x6e   : > { %507 = vmatpush.msrb.mxu0 %v1317_v15  ;;  %570 = vmatpush.msrb.mxu1 %v561_v60 }
  0x70   : > { %508 = vmatpush.msrb.mxu0 %v1323_v19  ;;  %571 = vmatpush.msrb.mxu1 %v560_v61 }
  0x72   : > { %509 = vmatpush.msrb.mxu0 %v1330_v24  ;;  %572 = vmatpush.msrb.mxu1 %v559_v62 }
  0x74   : > { %510 = vmatpush.msrb.mxu0 %v1334_v28  ;;  %573 = vmatpush.msrb.mxu1 %v558_v63 }
  0x76   : > { %511 = vmatpush.msrb.mxu0 %v1337_v31  ;;  %574 = vmatpush.msrb.mxu1 %v557_v0 }
  0x78   : > { %512 = vmatpush.msrb.mxu0 %v1340_v34  ;;  %575 = vmatpush.msrb.mxu1 %v556_v1 }
  0x7a   : > { %513 = vmatpush.msrb.mxu0 %v392_v38  ;;  %576 = vmatpush.msrb.mxu1 %v555_v2 }
  0x7c   : > { %514 = vmatpush.msrb.mxu0 %v389_v42  ;;  %577 = vmatpush.msrb.mxu1 %v554_v3 }
  0x7e   : > { %515 = vmatpush.msrb.mxu0 %v386_v46  ;;  %578 = vmatpush.msrb.mxu1 %v553_v4 }
  0x80   : > { %516 = vmatpush.msrb.mxu0 %v383_v51  ;;  %579 = vmatpush.msrb.mxu1 %v552_v5 }
  0x82   : > { %517 = vmatpush.msrb.mxu0 %v380_v53  ;;  %580 = vmatpush.msrb.mxu1 %v551_v6 }
  0x84   : > { %518 = vmatpush.msrb.mxu0 %v377_v56  ;;  %581 = vmatpush.msrb.mxu1 %v550_v7 }
  0x85   : > { %519 = vmatmul.f32.vlgmr.msrb.gmra.mxu0 %v374_v50 }
  0x86   : > { %582 = vmatpush.msrb.mxu1 %v549_v8 }
  0x88   : > { %583 = vmatpush.msrb.mxu1 %v548_v9 }
  0xe4   : > { %v440_v10 = vpop.f32.mrf.mxu0 }
  0xe5   : > { %v524_v11 = vrot.slane %v440_v10, 7 }
  0xe6   : > { %v460_v14 = vpop.f32.mrf.mxu1 }
  0xe8   : > { %v500_v12 = vpop.f32.mrf.mxu3 }
  0xe9   : > { %v527_v15 = vsel %vm526_vm2, %v500_v12, %v524_v11 }
  0xea   : > { %v536_v19 = vadd.f32 %v527_v15, %v460_v14 }
  0xeb   : > { %v480_v13 = vpop.f32.mrf.mxu2 }
  0xec   : > { %v529_v16 = vrot.slane %v480_v13, 1 }
 0x102   : > { %v520_v17 = vpop.f32.mrf.mxu0 }
 0x103   : > { %v532_v18 = vrot.slane %v520_v17, 2 }
 0x105   : > { %v535_v22 = vsel %vm534_vm3, %v529_v16, %v532_v18 }
 0x106   : > { %v537_v23 = vadd.f32 %v536_v19, %v535_v22 }
 0x108   : > { %v542_v24 = vadd.f32 %v871_v20, %v537_v23 }
 0x10a   : > { %v544_v25 = vmul.f32 1.442695, %v542_v24  ;;  %vm543_vm4 = vcmp.gt.f32.partialorder %v542_v24, 0.0 }
 0x10c   : > { %877 = vpow2.f32 %v544_v25 }
 0x112   : > { %v878_v26 = vpop.eup %877 }
 0x113   : > { %v755_v27 = vadd.f32 -1.0, %v878_v26 }
 0x115   : > { %v547_v28 = vsel %vm543_vm4, %v542_v24, %v755_v27 }
 0x116   : > { %584 = vmatmul.f32.vlgmr.msrb.gmra.mxu1 %v547_v28 }
 0x193   : > { %v585_v30 = vpop.f32.mrf.mxu1 }
 0x194   : > { %v586_v31 = vadd.f32 %v872_v29, %v585_v30 }
 0x196   : > { %v588_v32 = vadd.f32 %v586_v31, %v1327_v21 }
 0x198   : > { %589 = vst [vmem:[%s362_s10] sm:$0xff] %v588_v32 }
 0x199   : > { %1026 = shalt.err (!%p1023_p12)
}
 0x19a   : > { %775 = dma.vmem_to_hbm [thread:$0]  (%p1239_p0), %s606_s18, 128, %s608_s0, %s591_s24  }
 0x19b PF: > { %s1442_s4 = sld [smem:[#allocation16_spill]]  ;;  %p800_p13 = scmp.ge.s32.totalorder %s1109_s28, 2 }
 0x19d   : > { %p792_p2 = pnand %p800_p13, %p1246_p6 }
 0x19f   : > { %p793_p4 = pneg %p792_p2 }
 0x1a1   : > { %s619_s12 = sand.u32 1, %s1442_s4  }
 0x1a2   : > { %s620_s19 = scalar_lea.sflag [#allocation4], %s619_s12 }
 0x1a3   : > { %1076 = dma.done.wait (%p793_p4), %s620_s19, 128  }
 0x1a4   : > { %1078 = vsyncadd (%p793_p4), %s620_s19, 4294967168  ;;  %s26_s28 = sadd.s32 1, %s1109_s28   ;;  %s1443_s25 = sld [smem:[#allocation17_spill]] }
 0x1a5   : > { %p23_p5 = scmp.ge.s32.totalorder %s26_s28, 8   ;;  %s1444_s2 = sld [smem:[#allocation18_spill]] }
 0x1a6   : > { %s1445_s27 = sld [smem:[#allocation19_spill]]  ;;  %s1446_s21 = smov %s1085_s22 }
 0x1a7   : > { %s1447_s22 = smov %s1089_s23  ;;  %s1448_s23 = smov %s1253_s20 }
 0x1a8   : > { %s1449_s24 = smov %s1101_s26  ;;  %25 = sbr.rel (!%p23_p5) target bundleno = 14 (0xe), region = 110 }
 0x1ab   : > { %s1450_s26 = smov %s1444_s2 }
 0x1ad   :  { %626 = vsyncpa [#allocation3], 1 }
 0x1ae   :  { %628 = vsyncpa [#allocation3 + $0x1], 1 }
 0x1af   :  { %629 = vsyncpa [#allocation6], 1 }
 0x1b0   :  { %631 = vsyncpa [#allocation6 + $0x1], 1 }
 0x1b1   :  { %632 = vsyncpa [#allocation9], 1 }
 0x1b2   :  { %633 = vsyncpa [#allocation4], 1 }
 0x1b3   :  { %635 = vsyncpa [#allocation4 + $0x1], 1 }

</bundles_post_ra>
